<compile_context>
chip_gen: v7x
topology: tpu7x:2x2x1
jax: 0.10.0
libtpu: 0.0.40
codegen_flags: <defaults>
</compile_context>

<pallas_src>
import jax
import jax.numpy as jnp
from jax.experimental import pallas as pl
from jax.experimental.pallas import tpu as pltpu


def _pos_enc_kernel(x_ref, pe_ref, o_ref):
    # x_ref / o_ref: (ts, td) tile of one batch row (batch dim squeezed).
    # pe_ref:        matching (ts, td) tile of the positional table.
    # In-kernel cast: free (VALU slots are idle in a DMA-bound kernel) and
    # avoids a separate slice+cast HBM pass in the wrapper.
    o_ref[...] = x_ref[...] + pe_ref[...].astype(o_ref.dtype)


_LANE = 128
_SUBLANE = {4: 8, 2: 16, 1: 32}  # per-dtype sublane multiple

# Total resident VMEM target: 2 buffers x (x tile + out tile + pe tile).
# 12 MiB fits under v5e's 16 MiB default scoped-VMEM limit with headroom
# (v6e/v7x default scoped limit is 32 MiB; v7x physical VMEM is 64 MiB).
# If this budget is raised or pipeline depth increased (pl.Buffered(3)),
# set pltpu.CompilerParams(vmem_limit_bytes=...) explicitly.
_VMEM_BUDGET_BYTES = 12 * 1024 * 1024


def _round_up(n, m):
    return ((n + m - 1) // m) * m


def _choose_tiles(S, D, x_itemsize, pe_itemsize):
    """Pick (ts, td) so 2*(2*x + pe) tiles stay within _VMEM_BUDGET_BYTES."""
    sub = max(_SUBLANE.get(x_itemsize, 8), _SUBLANE.get(pe_itemsize, 8))
    per_elem = 2 * (2 * x_itemsize + pe_itemsize)  # double-buffered x+out+pe
    max_block_elems = max(sub * _LANE, _VMEM_BUDGET_BYTES // per_elem)

    # Tile D only when a single minimal (sub x D) block would blow the budget;
    # otherwise keep the full D as the block's last dim (legal for any D,
    # since a block dim equal to the full array dim satisfies the (8,128)
    # rule; a ragged last tile just becomes masked stores).
    if sub * D > max_block_elems and D > _LANE:
        td = max(_LANE, (max_block_elems // sub) // _LANE * _LANE)
    else:
        td = D

    ts = max(sub, (max_block_elems // td) // sub * sub)
    ts = min(ts, _round_up(S, sub))
    return ts, td


def learned_positional_encoding(x, pe_table, seq_length=None, *, donate_x=False):
    """out[b, s, d] = x[b, s, d] + pe_table[s, d]   (position_ids = arange)."""
    B, S, D = x.shape
    if seq_length is None:
        seq_length = S
    assert S == seq_length, "x must carry exactly seq_length positions"
    assert pe_table.shape[0] >= seq_length and pe_table.shape[1] == D
    # TODO(synk): the optional explicit `position_ids` argument of the PyTorch
    # forward (an arbitrary gather) is not implemented; only the default
    # arange(seq_length) path is.

    x_item = jnp.dtype(x.dtype).itemsize
    pe_item = jnp.dtype(pe_table.dtype).itemsize
    ts, td = _choose_tiles(S, D, x_item, pe_item)

    # No host-side pad/slice, no pe slice+cast: ragged last tiles along s / d
    # are masked in-kernel.  One HBM pass over x/out plus S*D of pe, total.
    # b innermost -> the pe block index (s, d) is unchanged across consecutive
    # b steps, so Pallas does not re-DMA the pe tile per batch row.
    grid = (pl.cdiv(S, ts), pl.cdiv(D, td), B)

    cost = pl.CostEstimate(
        flops=B * S * D,
        transcendentals=0,
        bytes_accessed=2 * B * S * D * x_item + S * D * pe_item,
    )

    return pl.pallas_call(
        _pos_enc_kernel,
        out_shape=jax.ShapeDtypeStruct((B, S, D), x.dtype),
        grid_spec=pltpu.PrefetchScalarGridSpec(
            num_scalar_prefetch=0,
            grid=grid,
            in_specs=[
                # one (ts, td) tile of one batch row per step; batch squeezed
                pl.BlockSpec((pl.Squeezed(), ts, td), lambda s, d, b: (b, s, d)),
                # matching pe tile; independent of b -> reused across batch
                pl.BlockSpec((ts, td), lambda s, d, b: (s, d)),
            ],
            out_specs=pl.BlockSpec(
                (pl.Squeezed(), ts, td), lambda s, d, b: (b, s, d)
            ),
        ),
        compiler_params=pltpu.CompilerParams(
            # s (and d) shard across TensorCores; b stays serial per core so
            # pe-tile reuse ordering is preserved and no core idles when B==1.
            dimension_semantics=("parallel", "parallel", "arbitrary"),
        ),
        cost_estimate=cost,
        # With padding gone, aliasing x -> out is always legal when the caller
        # donates x (saves the output HBM allocation; DMA bytes unchanged).
        input_output_aliases=({0: 0} if donate_x else {}),
    )(x, pe_table)


if __name__ == "__main__":
    key = jax.random.PRNGKey(0)
    k_x, k_pe, k_x2, k_pe2 = jax.random.split(key, 4)

    # --- check 1: small, lane-aligned shapes consistent with the module ---
    batch = 2
    max_position_embeddings = 16
    seq_length = 8
    embedding_dim = 128

    pe_table = jax.random.normal(
        k_pe, (max_position_embeddings, embedding_dim), dtype=jnp.float32
    )
    x = jax.random.normal(
        k_x, (batch, seq_length, embedding_dim), dtype=jnp.float32
    )

    out = learned_positional_encoding(x, pe_table, seq_length)
    out = jax.block_until_ready(out)
    ref = x + pe_table[:seq_length][None, :, :]
    assert out.shape == (batch, seq_length, embedding_dim)
    assert jnp.allclose(out, ref, atol=1e-6, rtol=1e-6)

    # --- check 2: ragged shapes (S not a multiple of 8, D not of 128) to
    #     exercise the masked last-tile path that replaced the pad/slice ---
    B2, S2, D2, MP2 = 3, 10, 96, 12
    pe_table2 = jax.random.normal(k_pe2, (MP2, D2), dtype=jnp.float32)
    x2 = jax.random.normal(k_x2, (B2, S2, D2), dtype=jnp.float32)

    out2 = learned_positional_encoding(x2, pe_table2, S2)
    out2 = jax.block_until_ready(out2)
    ref2 = x2 + pe_table2[:S2][None, :, :]
    assert out2.shape == (B2, S2, D2)
    assert jnp.allclose(out2, ref2, atol=1e-6, rtol=1e-6)

    print("KERNEL_OK")
</pallas_src>

<mosaic_0001>
module attributes {stable_mosaic.version = 11 : i64} {
  func.func @_pos_enc_kernel(%arg0: i32, %arg1: i32, %arg2: i32, %arg3: memref<1x8x128xf32, #tpu.memory_space<vmem>>, %arg4: memref<8x128xf32, #tpu.memory_space<vmem>>, %arg5: memref<1x8x128xf32, #tpu.memory_space<vmem>>) attributes {dimension_semantics = [#tpu.dimension_semantics<parallel>, #tpu.dimension_semantics<parallel>, #tpu.dimension_semantics<arbitrary>], iteration_bounds = array<i64: 1, 1, 2>, scalar_prefetch = 0 : i64, scratch_operands = 0 : i64, tpu.core_type = #tpu.core_type<tc>, window_params = [{transform_indices = @transform_0, window_bounds = array<i64: 1, 8, 128>}, {transform_indices = @transform_1, window_bounds = array<i64: 8, 128>}, {transform_indices = @transform_2, window_bounds = array<i64: 1, 8, 128>}]} {
    %c0 = arith.constant 0 : index
    %c0_0 = arith.constant 0 : index
    %c0_1 = arith.constant 0 : index
    %0 = vector.load %arg3[%c0, %c0_0, %c0_1] : memref<1x8x128xf32, #tpu.memory_space<vmem>>, vector<1x8x128xf32>
    %1 = vector.shape_cast %0 : vector<1x8x128xf32> to vector<8x128xf32>
    %c0_2 = arith.constant 0 : index
    %c0_3 = arith.constant 0 : index
    %2 = vector.load %arg4[%c0_2, %c0_3] : memref<8x128xf32, #tpu.memory_space<vmem>>, vector<8x128xf32>
    %3 = arith.addf %1, %2 : vector<8x128xf32>
    %c0_4 = arith.constant 0 : index
    %c0_5 = arith.constant 0 : index
    %c0_6 = arith.constant 0 : index
    %4 = vector.load %arg5[%c0_4, %c0_5, %c0_6] : memref<1x8x128xf32, #tpu.memory_space<vmem>>, vector<1x8x128xf32>
    %5 = vector.shape_cast %4 : vector<1x8x128xf32> to vector<8x128xf32>
    %6 = vector.shape_cast %3 : vector<8x128xf32> to vector<1x8x128xf32>
    tpu.vector_store %arg5[%c0_4, %c0_5, %c0_6], %6 {strides = array<i32>} : memref<1x8x128xf32, #tpu.memory_space<vmem>>, vector<1x8x128xf32>,
    return
  }
  func.func @transform_0(%arg0: i32, %arg1: i32, %arg2: i32) -> (i32, i32, i32) {
    %c0_i32 = arith.constant 0 : i32
    return %arg2, %arg0, %arg1 : i32, i32, i32
  }
  func.func @transform_1(%arg0: i32, %arg1: i32, %arg2: i32) -> (i32, i32) {
    %c0_i32 = arith.constant 0 : i32
    return %arg0, %arg1 : i32, i32
  }
  func.func @transform_2(%arg0: i32, %arg1: i32, %arg2: i32) -> (i32, i32, i32) {
    %c0_i32 = arith.constant 0 : i32
    return %arg2, %arg0, %arg1 : i32, i32, i32
  }
}

</mosaic_0001>

<bundles_post_ra>
// kernel: tpu_custom_call.1
= control target key start
LH: loop header
LB: loop body
LE: loop exit
PB: predicated region body
PF: predicated region fallthrough
CT: control target
= control target key end

     0   :  { %7 = vsyncpa [#allocation3], 0  ;;  %s800_s0 = inlined_call_operand.hbm [shape: f32[2,8,128], index: 0, kind: input, shape index: {}]   ;;  %s801_s1 = inlined_call_operand.hbm [shape: f32[16,128], index: 1, kind: input, shape index: {}]   ;;  %s802_s2 = inlined_call_operand.hbm [shape: f32[2,8,128], index: 2, kind: output, shape index: {}]  }
   0x1   :  { %9 = vsyncpa [#allocation3 + $0x1], 0 }
   0x2   :  { %10 = vsyncpa [#allocation6], 0 }
   0x3   :  { %11 = vsyncpa [#allocation4], 0 }
   0x4   :  { %13 = vsyncpa [#allocation4 + $0x1], 0  ;;  %s581_s9 = smov 0   ;;  %s583_s10 = smov 0  }
   0x5   :  { %s585_s11 = smov 0   ;;  %s587_s12 = smov 0  }
   0x6   :  { %s589_s13 = smov 0   ;;  %s591_s14 = smov 0  }
   0x7 LB: > { %s329_s15 = sadd.s32 4294967295, %s561_s14   ;;  %s330_s16 = sadd.s32 4294967294, %s561_s14   ;;  %s561_s14 = sphi %s591_s14, %s19_s14   ;;  %s557_s13 = sphi %s589_s13, %s827_s13   ;;  %s553_s12 = sphi %s587_s12, %s826_s12   ;;  %s549_s11 = sphi %s585_s11, %s825_s11   ;;  %s545_s10 = sphi %s583_s10, %s824_s10   ;;  %s541_s9 = sphi %s581_s9, %s823_s9  }
   0x8   : > { %p62_p0 = scmp.ne.s32.totalorder %s545_s10, %s541_s9  ;;  %p615_p1 = scmp.eq.s32.totalorder %s329_s15, 0 }
   0x9   : > { %p619_p2 = scmp.eq.s32.totalorder %s329_s15, 1  ;;  %p124_p3 = scmp.eq.s32.totalorder %s330_s16, 1 }
   0xa   : > { %s807_s17 = scalar_select %p615_p1, 1, 0 }
   0xb   : > { %s808_s18 = scalar_select %p619_p2, 1, 0 }
   0xc   : > { %p625_p4 = por %p615_p1, %p62_p0  ;;  %p331_p5 = scmp.ge.s32.totalorder %s561_s14, 1 }
   0xd   : > { %p630_p6 = por %p124_p3, %p62_p0  ;;  %p131_p7 = scmp.lt.s32.totalorder %s561_s14, 3 }
   0xe   : > { %s809_s19 = scalar_select %p625_p4, 1, 0 }
   0xf   : > { %s810_s20 = scalar_select %p630_p6, 1, 0 }
  0x10   : > { %p635_p8 = pnand %p331_p5, %p131_p7  ;;  %s563_s22 = smov [#allocation5]  }
  0x11   : > { %s147_s23 = sshll.u32 %s563_s22, 4  ;;  %s31_s25 = sadd.s32 1, %s557_s13  ;;  %s148_s23 = int_to_ptr.vmem [resolvable:$true] %s147_s23 }
  0x12   : > { %s811_s21 = scalar_select %p635_p8, 1, 0 }
  0x13   : > { %p352_p10 = pneg %p635_p8  ;;  %s49_s26 = sadd.s32 1, %s549_s11 }
  0x14   : > { %p650_p12 = scmp.ge.s32.totalorder %s31_s25, 2  ;;  %s417_s30 = scalar_lea.hbm %s801_s1, 128 }
  0x15   : > { %p644_p11 = pnand %p352_p10, %p615_p1  ;;  %p418_p13 = scmp.ne.s32.totalorder %s801_s1, %s417_s30 }
  0x16   : > { %s813_s27 = scalar_select %p650_p12, 1, 0 }
  0x17   : > { %p419_p0 = pneg %p644_p11  ;;  %s422_s7 = scalar_lea.hbm %s801_s1, 256 }
  0x18   : > { %p423_p7 = scmp.lt.u32.totalorder %s422_s7, %s417_s30  ;;  %p424_p10 = scmp.lt.u32.totalorder %s417_s30, %s801_s1 }
  0x19   : > { %p420_p3 = pnand %p419_p0, %p418_p13 }
  0x1a   : > { %p425_p9 = por %p424_p10, %p423_p7 }
  0x1b   : > { %p421_p5 = pneg %p420_p3 }
  0x1d   : > { %p426_p6 = pnand %p425_p9, %p421_p5 }
  0x1f   : > { %429 = shalt.err (!%p426_p6)
}
  0x20   : > { %s430_s16 = scalar_lea.vmem %s148_s23, 128  ;;  %p438_p2 = scmp.lt.s32.totalorder %s148_s23, %s148_s23 }
  0x21   : > { %p431_p1 = scmp.ne.s32.totalorder %s148_s23, %s430_s16  ;;  %p439_p12 = scmp.lt.s32.totalorder %s430_s16, %s430_s16 }
  0x23   : > { %p433_p4 = pnand %p431_p1, %p419_p0  ;;  %p440_p13 = por %p439_p12, %p438_p2 }
  0x25   : > { %p434_p8 = pneg %p433_p4 }
  0x27   : > { %p441_p3 = pnand %p440_p13, %p434_p8 }
  0x29   : > { %444 = shalt.err (!%p441_p3)
}
  0x2a   : > { %355 = dma.hbm_to_vmem [thread:$0]  (!%p644_p11), %s801_s1, 128, %s148_s23, [#allocation6]  }
  0x2b   : > { %p814_p1 = scmp.ne.s32.totalorder %s813_s27, 0  ;;  %p56_p2 = scmp.ne.s32.totalorder %s549_s11, %s545_s10 }
  0x2c   : > { %p57_p4 = scmp.eq.s32.totalorder %s561_s14, 0  ;;  %p365_p6 = scmp.lt.s32.totalorder %s561_s14, 2 }
  0x2d   : > { %s829_s25 = smov (%p814_p1, %s31_s25), 0  ;;  %p815_p12 = scmp.ne.s32.totalorder %s808_s18, 0 }
  0x2e   : > { %s42_s24 = ssub.s32 %s557_s13, %s829_s25  ;;  %p58_p9 = por %p57_p4, %p56_p2 }
  0x2f   : > { %p47_p8 = scmp.eq.s32.totalorder %s42_s24, 0  ;;  %p685_p0 = por %p815_p12, %p56_p2 }
  0x30   : > { %s158_s30 = sand.u32 1, %s549_s11   ;;  %s335_s27 = sshll.u32 %s557_s13, 7 }
  0x31   : > { %s693_s3 = scalar_select %p47_p8, %s549_s11, %s49_s26  }
  0x32   : > { %s334_s23 = sshll.u32 %s158_s30, 3  ;;  %s699_s6 = scalar_lea.hbm %s800_s0, %s335_s27 }
  0x33   : > { %s162_s18 = scalar_lea.vmem [#allocation2], %s334_s23  ;;  %p703_p11 = pnand %p365_p6, %p58_p9 }
  0x34   : > { %s171_s7 = sshll.u32 %s162_s18, 4  ;;  %s159_s26 = scalar_lea.sflag [#allocation3], %s158_s30  ;;  %s701_s7 = int_to_ptr.vmem [resolvable:$true] %s171_s7 }
  0x35   : > { %s445_s15 = scalar_lea.hbm %s699_s6, 128  ;;  %p447_p7 = pneg %p703_p11 }
  0x36   : > { %p446_p5 = scmp.ne.s32.totalorder %s699_s6, %s445_s15  ;;  %s450_s28 = scalar_lea.hbm %s800_s0, 256 }
  0x37   : > { %p451_p3 = scmp.lt.u32.totalorder %s699_s6, %s800_s0  ;;  %p452_p1 = scmp.lt.u32.totalorder %s450_s28, %s445_s15 }
  0x38   : > { %p448_p10 = pnand %p447_p7, %p446_p5  ;;  %p454_p4 = scmp.lt.u32.totalorder %s445_s15, %s699_s6 }
  0x39   : > { %p453_p2 = por %p452_p1, %p451_p3 }
  0x3a   : > { %p449_p13 = pneg %p448_p10 }
  0x3b   : > { %p455_p6 = por %p454_p4, %p453_p2 }
  0x3d   : > { %p456_p8 = pnand %p455_p6, %p449_p13 }
  0x3f   : > { %459 = shalt.err (!%p456_p8)
}
  0x40   : > { %s460_s30 = scalar_lea.vmem %s701_s7, 128  ;;  %s564_s27 = smov [#allocation2]  }
  0x41   : > { %p461_p9 = scmp.ne.s32.totalorder %s701_s7, %s460_s30  ;;  %s465_s4 = sshll.u32 %s564_s27, 4  ;;  %s466_s4 = int_to_ptr.vmem [resolvable:$false] %s465_s4 }
  0x42   : > { %s467_s5 = scalar_lea.vmem %s466_s4, 256  ;;  %p468_p10 = scmp.lt.s32.totalorder %s701_s7, %s466_s4 }
  0x43   : > { %p463_p12 = pnand %p461_p9, %p447_p7  ;;  %p469_p3 = scmp.lt.s32.totalorder %s467_s5, %s460_s30 }
  0x45   : > { %p464_p5 = pneg %p463_p12  ;;  %p470_p1 = por %p469_p3, %p468_p10 }
  0x47   : > { %p471_p2 = pnand %p470_p1, %p464_p5 }
  0x49   : > { %474 = shalt.err (!%p471_p2)
}
  0x4a   : > { %359 = dma.hbm_to_vmem [thread:$0]  (!%p703_p11), %s699_s6, 128, %s701_s7, %s159_s26  }
  0x4b   : > { %p818_p13 = scmp.ne.s32.totalorder %s811_s21, 0 }
  0x4c   : > { %s735_s18 = sand.u32 (!%p818_p13), 1, %s545_s10   ;;  %p819_p7 = scmp.ne.s32.totalorder (!%p818_p13), %s809_s19, 0 }
  0x4d   : > { %180 = sbr.rel (%p818_p13) target bundleno = 113 (0x71), region = 28  ;;  %s337_s15 = sshll.u32 (!%p818_p13), %s735_s18, 3 }
  0x4e   : > { %s183_s16 = scalar_lea.sflag (!%p818_p13), [#allocation3], %s735_s18  ;;  %s186_s22 = scalar_lea.vmem (!%p818_p13), [#allocation2], %s337_s15 }
  0x54   : > { %528 = dma.done.wait (%p819_p7), %s183_s16, 128  }
  0x55   : > { %530 = vsyncadd (%p819_p7), %s183_s16, 4294967168  ;;  %p820_p4 = scmp.ne.s32.totalorder %s807_s17, 0 }
  0x57   : > { %532 = dma.done.wait (%p820_p4), [#allocation6], 128  }
  0x58   : > { %534 = vsyncadd (%p820_p4), [#allocation6], 4294967168  ;;  %s210_s21 = scalar_lea.vmem [#allocation7], %s337_s15  ;;  %s341_s7 = sshll.u32 %s553_s12, 7  ;;  %v211_v0 = vld [vmem:[%s186_s22] sm:$0xff]  ;;  %v212_v1 = vld [vmem:[#allocation5] sm:$0xff] }
  0x59   : > { %s231_s6 = sshll.u32 %s210_s21, 4  ;;  %v213_v2 = vadd.f32 %v212_v1, %v211_v0  ;;  %s753_s26 = scalar_lea.hbm %s802_s2, %s341_s7  ;;  %s748_s6 = int_to_ptr.vmem [resolvable:$true] %s231_s6 }
  0x5a   : > { %s216_s17 = scalar_lea.sflag [#allocation4], %s735_s18  ;;  %s475_s28 = scalar_lea.vmem %s748_s6, 128 }
  0x5b   : > { %214 = vst [vmem:[%s210_s21] sm:$0xff] %v213_v2  ;;  %p476_p11 = scmp.ne.s32.totalorder %s748_s6, %s475_s28  ;;  %s565_s12 = smov [#allocation7]  }
  0x5c   : > { %s479_s24 = sshll.u32 %s565_s12, 4  ;;  %s480_s24 = int_to_ptr.vmem [resolvable:$false] %s479_s24 }
  0x5d   : > { %p477_p6 = pnand %p476_p11, %p685_p0  ;;  %s481_s23 = scalar_lea.vmem %s480_s24, 256 }
  0x5e   : > { %p482_p9 = scmp.lt.s32.totalorder %s748_s6, %s480_s24  ;;  %p483_p12 = scmp.lt.s32.totalorder %s481_s23, %s475_s28 }
  0x5f   : > { %p478_p8 = pneg %p477_p6 }
  0x60   : > { %p484_p5 = por %p483_p12, %p482_p9 }
  0x62   : > { %p485_p10 = pnand %p484_p5, %p478_p8 }
  0x64   : > { %488 = shalt.err (!%p485_p10)
}
  0x65   : > { %s489_s30 = scalar_lea.hbm %s753_s26, 128  ;;  %s493_s5 = scalar_lea.hbm %s802_s2, 256 }
  0x66   : > { %p490_p3 = scmp.ne.s32.totalorder %s753_s26, %s489_s30  ;;  %p494_p13 = scmp.lt.u32.totalorder %s753_s26, %s802_s2 }
  0x67   : > { %p495_p7 = scmp.lt.u32.totalorder %s493_s5, %s489_s30  ;;  %p497_p11 = scmp.lt.u32.totalorder %s489_s30, %s753_s26 }
  0x68   : > { %p491_p1 = pnand %p490_p3, %p685_p0 }
  0x69   : > { %p496_p4 = por %p495_p7, %p494_p13 }
  0x6a   : > { %p492_p2 = pneg %p491_p1 }
  0x6b   : > { %p498_p6 = por %p497_p11, %p496_p4 }
  0x6d   : > { %p499_p8 = pnand %p498_p6, %p492_p2 }
  0x6f   : > { %502 = shalt.err (!%p499_p8)
}
  0x70   : > { %350 = dma.vmem_to_hbm [thread:$0]  (%p685_p0), %s748_s6, 128, %s753_s26, %s216_s17  }
  0x71 PF: > { %s243_s16 = sand.u32 1, %s541_s9   ;;  %p821_p9 = scmp.ne.s32.totalorder %s810_s20, 0 }
  0x72   : > { %p822_p12 = scmp.ge.s32.totalorder %s561_s14, 2  ;;  %s244_s22 = scalar_lea.sflag [#allocation4], %s243_s16 }
  0x74   : > { %p361_p5 = pnand %p822_p12, %p821_p9 }
  0x76   : > { %536 = dma.done.wait (!%p361_p5), %s244_s22, 128  }
  0x77   : > { %538 = vsyncadd (!%p361_p5), %s244_s22, 4294967168  ;;  %s19_s14 = sadd.s32 1, %s561_s14   ;;  %s823_s9 = smov %s545_s10 }
  0x78   : > { %p16_p10 = scmp.ge.s32.totalorder %s19_s14, 4   ;;  %s824_s10 = smov %s549_s11 }
  0x79   : > { %s825_s11 = smov %s693_s3  ;;  %s826_s12 = smov %s557_s13 }
  0x7a   : > { %s827_s13 = smov %s829_s25  ;;  %18 = sbr.rel (!%p16_p10) target bundleno = 7 (0x7), region = 78 }
  0x81   :  { %249 = vsyncpa [#allocation3], 1 }
  0x82   :  { %251 = vsyncpa [#allocation3 + $0x1], 1 }
  0x83   :  { %252 = vsyncpa [#allocation6], 1 }
  0x84   :  { %253 = vsyncpa [#allocation4], 1 }
  0x85   :  { %255 = vsyncpa [#allocation4 + $0x1], 1 }

</bundles_post_ra>
